<compile_context>
chip_gen: v6e
topology: v6e:2x2x1
jax: 0.10.0
libtpu: 0.0.40
codegen_flags: <defaults>
</compile_context>

<pallas_src>
import functools

import numpy as np
import jax
import jax.numpy as jnp
from jax.experimental import pallas as pl
from jax.experimental.pallas import tpu as pltpu

_SUBLANES = 8
_LANES = 128


def _round_up(x, m):
    return (x + m - 1) // m * m


# ----------------------------------------------------------------------------
# Parameter construction (deterministic, mirrors nn.Linear default init)
# ----------------------------------------------------------------------------
def make_linear_params(key, fan_in, fan_out, bias=True):
    kw, kb = jax.random.split(key)
    bound = 1.0 / np.sqrt(fan_in)
    W = jax.random.uniform(kw, (fan_in, fan_out), jnp.float32, -bound, bound)
    if not bias:
        return W, None
    b = jax.random.uniform(kb, (1, fan_out), jnp.float32, -bound, bound)
    return W, b


def make_mlp_params(key, ninf, noutf, hidden_layersf):
    """Mirrors MyBigNetwork.layers_maker (the ninf != noutf branch)."""
    assert ninf != noutf
    widths = np.linspace(ninf, noutf, hidden_layersf).astype(int)
    dims = [(int(widths[i]), int(widths[i + 1])) for i in range(hidden_layersf - 1)]
    dims.append((int(widths[-1]), int(widths[-1])))
    keys = jax.random.split(key, len(dims))
    return [make_linear_params(k, fi, fo) for k, (fi, fo) in zip(keys, dims)]


def make_network_params(key, nin, nmid, hidden_layers):
    k_enc, k_dec, k_kop = jax.random.split(key, 3)
    enc = make_mlp_params(k_enc, nin, nmid, hidden_layers)
    dec = make_mlp_params(k_dec, nmid, nin, hidden_layers)
    K, _ = make_linear_params(k_kop, nmid, nmid, bias=False)  # Linear(nmid,nmid,bias=False)
    return enc, K, dec


# ----------------------------------------------------------------------------
# One-time host-side preprocessing: K powers, block-diag decoder, packing.
# (Hoisted out of the per-call path -- run once, reuse the packed buffers.)
# ----------------------------------------------------------------------------
def _pad_internal_widths(layers):
    """Zero-pad internal MLP widths up to multiples of 8 sublanes.

    Zero output columns stay exactly zero through bias-add and SiLU(0)=0, and
    the corresponding zero rows of the next weight contribute nothing to its
    matmul, so results are bit-identical while every weight slice becomes
    sublane-exact (no masked/partial loads)."""
    n = len(layers)
    widths = [layers[0][0].shape[0]] + [W.shape[1] for W, _ in layers]
    padded = list(widths)
    for i in range(1, n):  # internal widths only (keep MLP input/output widths)
        padded[i] = _round_up(widths[i], _SUBLANES)
    out = []
    for i, (W, b) in enumerate(layers):
        fi, fo = W.shape
        pfi, pfo = padded[i], padded[i + 1]
        Wp = np.zeros((pfi, pfo), np.float32)
        Wp[:fi, :fo] = np.asarray(W, np.float32)
        bp = np.zeros((1, pfo), np.float32)
        bp[:, :fo] = np.asarray(b, np.float32)
        out.append((Wp, bp))
    return out


def _pack_blocks(blocks):
    """Pack 2-D blocks row-wise into one (rows, ncols) f32 buffer.
    Every block starts on a sublane boundary at column 0."""
    ncols = _round_up(max(a.shape[1] for a in blocks), _LANES)
    layout, off = [], 0
    for arr in blocks:
        r, c = arr.shape
        layout.append((int(off), int(r), int(c)))
        off += _round_up(r, _SUBLANES)
    total_rows = _round_up(max(off, _SUBLANES), _SUBLANES)
    buf = np.zeros((total_rows, ncols), np.float32)
    for (o, r, c), arr in zip(layout, blocks):
        buf[o:o + r, :c] = np.asarray(arr, np.float32)
    return jnp.asarray(buf), tuple(layout)


def prepare_params(params, T):
    """One-time prep. Returns (packed_fast, packed_dec, layouts).

    packed_fast: encoder weights/biases + K_stack (needed before encode starts).
    packed_dec : block-diagonal decoder weights + tiled biases (large, ~75% kron
                 zeros) -- its DMA is overlapped with encoder compute in-kernel.
    layouts    : static (offset, rows, cols) tuples baked into the kernel."""
    enc, K, dec = params
    nmid = int(K.shape[0])

    enc_np = [(np.asarray(W, np.float32), np.asarray(b, np.float32)) for W, b in enc]
    dec_np = [(np.asarray(W, np.float32), np.asarray(b, np.float32)) for W, b in dec]
    K_np = np.asarray(K, np.float64)

    # K_stack = [I | K | K^2 | ... | K^{T-1}]  (float64 accumulation, one-time)
    powers = [np.eye(nmid, dtype=np.float64)]
    for _ in range(1, T):
        powers.append(powers[-1] @ K_np)
    k_stack = np.concatenate(powers, axis=1).astype(np.float32)      # (nmid, T*nmid)

    # Decoder batched over T timesteps: (B,T*ni) @ kron(I_T,W) + tile(b,T)
    eye_t = np.eye(T, dtype=np.float32)
    dec_big = [(np.kron(eye_t, W), np.tile(b, (1, T))) for W, b in dec_np]

    enc_p = _pad_internal_widths(enc_np)
    dec_p = _pad_internal_widths(dec_big)

    fast_blocks = []
    for W, b in enc_p:
        fast_blocks += [W, b]
    fast_blocks.append(k_stack)
    dec_blocks = []
    for W, b in dec_p:
        dec_blocks += [W, b]

    packed_fast, fast_layout = _pack_blocks(fast_blocks)
    packed_dec, dec_layout = _pack_blocks(dec_blocks)

    n_enc, n_dec = len(enc_p), len(dec_p)
    enc_l = tuple((fast_layout[2 * i], fast_layout[2 * i + 1]) for i in range(n_enc))
    k_l = fast_layout[2 * n_enc]
    dec_l = tuple((dec_layout[2 * i], dec_layout[2 * i + 1]) for i in range(n_dec))
    return packed_fast, packed_dec, (enc_l, k_l, dec_l)


# ----------------------------------------------------------------------------
# Kernel compute helpers (shared by both kernel variants)
# ----------------------------------------------------------------------------
def _load(p_ref, block):
    off, rows, cols = block                    # static python ints
    return p_ref[off:off + rows, 0:cols]       # sublane-aligned static slice


def _mlp(h, p_ref, layer_blocks):
    n = len(layer_blocks)
    for i, (wb, bb) in enumerate(layer_blocks):
        W = _load(p_ref, wb)
        b = _load(p_ref, bb)
        h = jnp.dot(h, W, preferred_element_type=jnp.float32) + b
        if i < n - 1:
            h = h * jax.nn.sigmoid(h)          # SiLU (all layers except the last)
    return h


def _make_small_kernel(enc_l, k_l, dec_l):
    """Grid-less kernel with split, overlapped parameter DMA."""
    def kernel(x_ref, fast_hbm, dec_hbm, out_ref, fast_vmem, dec_vmem, sems):
        cp_fast = pltpu.make_async_copy(fast_hbm, fast_vmem, sems.at[0])
        cp_dec = pltpu.make_async_copy(dec_hbm, dec_vmem, sems.at[1])
        cp_fast.start()
        cp_dec.start()                          # large decoder copy runs under encoder compute
        cp_fast.wait()

        x = x_ref[...].astype(jnp.float32)
        z0 = _mlp(x, fast_vmem, enc_l)                                        # (B, nmid)
        k_stack = _load(fast_vmem, k_l)                                       # (nmid, T*nmid)
        z_all = jnp.dot(z0, k_stack, preferred_element_type=jnp.float32)     # (B, T*nmid)

        cp_dec.wait()
        y = _mlp(z_all, dec_vmem, dec_l)                                      # (B, T*nin)
        out_ref[...] = y.astype(out_ref.dtype)                                # one lane-dense store
    return kernel


def _make_batched_kernel(enc_l, k_l, dec_l):
    """Batch-tiled kernel (auto-pipelined BlockSpec DMA, parallel grid axis)."""
    def kernel(x_ref, fast_ref, dec_ref, out_ref):
        x = x_ref[...].astype(jnp.float32)
        z0 = _mlp(x, fast_ref, enc_l)
        k_stack = _load(fast_ref, k_l)
        z_all = jnp.dot(z0, k_stack, preferred_element_type=jnp.float32)
        y = _mlp(z_all, dec_ref, dec_l)
        out_ref[...] = y.astype(out_ref.dtype)
    return kernel


def _vmem_limit_bytes(*nbytes):
    # Generous headroom; guards the T^2 kron growth against v7x's 64 MiB VMEM
    # (32 MiB default scoped) while staying tiny at T=8 (~0.5 MiB actual use).
    est = int(sum(nbytes))
    return int(min(max(6 * est + (2 << 20), 16 << 20), 96 << 20))


# ----------------------------------------------------------------------------
# pallas_call wrappers
# ----------------------------------------------------------------------------
def _forward_small(x, packed_fast, packed_dec, layouts, T, nin):
    enc_l, k_l, dec_l = layouts
    B = x.shape[0]
    return pl.pallas_call(
        _make_small_kernel(enc_l, k_l, dec_l),
        out_shape=jax.ShapeDtypeStruct((B, T * nin), x.dtype),
        in_specs=[
            pl.BlockSpec(memory_space=pltpu.MemorySpace.VMEM),   # x: tiny, auto-DMA
            pl.BlockSpec(memory_space=pl.ANY),                   # packed_fast: manual DMA
            pl.BlockSpec(memory_space=pl.ANY),                   # packed_dec : manual DMA
        ],
        out_specs=pl.BlockSpec(memory_space=pltpu.MemorySpace.VMEM),
        scratch_shapes=[
            pltpu.VMEM(packed_fast.shape, jnp.float32),
            pltpu.VMEM(packed_dec.shape, jnp.float32),
            pltpu.SemaphoreType.DMA((2,)),
        ],
        compiler_params=pltpu.CompilerParams(
            vmem_limit_bytes=_vmem_limit_bytes(
                x.size * 4, B * T * nin * 4,
                packed_fast.size * 4, packed_dec.size * 4)),
    )(x, packed_fast, packed_dec)


def _forward_batched(x, packed_fast, packed_dec, layouts, T, nin, tb):
    enc_l, k_l, dec_l = layouts
    B, nfeat = x.shape
    return pl.pallas_call(
        _make_batched_kernel(enc_l, k_l, dec_l),
        out_shape=jax.ShapeDtypeStruct((B, T * nin), x.dtype),
        grid=(B // tb,),
        in_specs=[
            pl.BlockSpec((tb, nfeat), lambda i: (i, 0)),
            pl.BlockSpec(packed_fast.shape, lambda i: (0, 0)),   # resident across grid
            pl.BlockSpec(packed_dec.shape, lambda i: (0, 0)),
        ],
        out_specs=pl.BlockSpec((tb, T * nin), lambda i: (i, 0)),
        compiler_params=pltpu.CompilerParams(
            dimension_semantics=("parallel",),                   # v7x: split rows across TCs
            vmem_limit_bytes=_vmem_limit_bytes(
                2 * tb * nfeat * 4, 2 * tb * T * nin * 4,
                2 * packed_fast.size * 4, 2 * packed_dec.size * 4)),
    )(x, packed_fast, packed_dec)


@functools.partial(jax.jit, static_argnames=("layouts", "T", "nin"))
def koopman_forward(x, packed_fast, packed_dec, *, layouts, T, nin):
    """Jitted forward. `packed_*` are persistent device buffers from prepare_params."""
    B = x.shape[0]
    tb = 128
    if B % tb == 0 and B // tb >= 2:
        out = _forward_batched(x, packed_fast, packed_dec, layouts, T, nin, tb)
    else:
        out = _forward_small(x, packed_fast, packed_dec, layouts, T, nin)
    # Row-major relabel (B, T*nin) -> (B, T, nin): identical memory layout, free.
    return out.reshape(B, T, nin)


# ----------------------------------------------------------------------------
# Pure-JAX reference (same math as the torch module, sequential recurrence)
# ----------------------------------------------------------------------------
def reference_forward(x, tsteps, params):
    enc, K, dec = params

    def mlp(h, layers):
        n = len(layers)
        for i, (W, b) in enumerate(layers):
            h = h @ W + b
            if i < n - 1:
                h = h * jax.nn.sigmoid(h)
        return h

    z = mlp(x, enc)
    zs = [z]
    for _ in range(1, tsteps.shape[0]):
        zs.append(zs[-1] @ K)
    z_all = jnp.stack(zs, axis=1)      # (B, T, nmid) == torch.stack(dim=1)
    return mlp(z_all, dec)             # decoder acts on the last dim


# ----------------------------------------------------------------------------
# Main
# ----------------------------------------------------------------------------
if __name__ == "__main__":
    nin, nmid, hidden_layers = 16, 8, 3
    B, T = 4, 8

    key = jax.random.PRNGKey(0)
    k_params, k_x, k_xb = jax.random.split(key, 3)

    params = make_network_params(k_params, nin, nmid, hidden_layers)
    x = jax.random.normal(k_x, (B, nin), dtype=jnp.float32)
    tsteps = jnp.arange(T, dtype=jnp.float32)   # only its length is used, as in torch

    # One-time preprocessing; the packed buffers persist on device across calls.
    packed_fast, packed_dec, layouts = prepare_params(params, T)
    packed_fast = jax.device_put(packed_fast)
    packed_dec = jax.device_put(packed_dec)

    # Small-batch path (grid-less, split/overlapped parameter DMA).
    out = koopman_forward(x, packed_fast, packed_dec, layouts=layouts, T=T, nin=nin)
    out = jax.block_until_ready(out)
    ref = jax.block_until_ready(reference_forward(x, tsteps, params))
    assert out.shape == (B, T, nin), out.shape
    np.testing.assert_allclose(np.asarray(out), np.asarray(ref), rtol=1e-5, atol=2e-5)

    # Batch-parallel grid path (uses both TensorCores on v7x).
    Bb = 256
    xb = jax.random.normal(k_xb, (Bb, nin), dtype=jnp.float32)
    out_b = jax.block_until_ready(
        koopman_forward(xb, packed_fast, packed_dec, layouts=layouts, T=T, nin=nin))
    ref_b = jax.block_until_ready(reference_forward(xb, tsteps, params))
    assert out_b.shape == (Bb, T, nin), out_b.shape
    np.testing.assert_allclose(np.asarray(out_b), np.asarray(ref_b), rtol=1e-5, atol=2e-5)

    print("KERNEL_OK")
</pallas_src>

<mosaic_0001>
module attributes {stable_mosaic.version = 11 : i64} {
  func.func @kernel(%arg0: memref<4x16xf32, #tpu.memory_space<vmem>>, %arg1: memref<72x128xf32, #tpu.memory_space<any>>, %arg2: memref<312x128xf32, #tpu.memory_space<any>>, %arg3: memref<4x128xf32, #tpu.memory_space<vmem>>, %arg4: memref<72x128xf32, #tpu.memory_space<vmem>>, %arg5: memref<312x128xf32, #tpu.memory_space<vmem>>, %arg6: memref<2x!tpu.dma_semaphore, #tpu.memory_space<semaphore_mem>>) attributes {dimension_semantics = [], scalar_prefetch = 0 : i64, scratch_operands = 3 : i64, tpu.core_type = #tpu.core_type<tc>} {
    %c0_i32 = arith.constant 0 : i32
    %0 = tpu.memref_slice %arg6[%c0_i32] : memref<2x!tpu.dma_semaphore, #tpu.memory_space<semaphore_mem>> -> memref<1x!tpu.dma_semaphore, #tpu.memory_space<semaphore_mem>>
    %1 = tpu.memref_squeeze %0 : memref<1x!tpu.dma_semaphore, #tpu.memory_space<semaphore_mem>> -> memref<!tpu.dma_semaphore, #tpu.memory_space<semaphore_mem>>
    tpu.enqueue_dma source(%arg1 : memref<72x128xf32, #tpu.memory_space<any>>) target(%arg4 : memref<72x128xf32, #tpu.memory_space<vmem>>) target_semaphore(%1 : memref<!tpu.dma_semaphore, #tpu.memory_space<semaphore_mem>>)
    %c1_i32 = arith.constant 1 : i32
    %2 = tpu.memref_slice %arg6[%c1_i32] : memref<2x!tpu.dma_semaphore, #tpu.memory_space<semaphore_mem>> -> memref<1x!tpu.dma_semaphore, #tpu.memory_space<semaphore_mem>>
    %3 = tpu.memref_squeeze %2 : memref<1x!tpu.dma_semaphore, #tpu.memory_space<semaphore_mem>> -> memref<!tpu.dma_semaphore, #tpu.memory_space<semaphore_mem>>
    tpu.enqueue_dma source(%arg2 : memref<312x128xf32, #tpu.memory_space<any>>) target(%arg5 : memref<312x128xf32, #tpu.memory_space<vmem>>) target_semaphore(%3 : memref<!tpu.dma_semaphore, #tpu.memory_space<semaphore_mem>>)
    %c0_i32_0 = arith.constant 0 : i32
    %4 = tpu.memref_slice %arg6[%c0_i32_0] : memref<2x!tpu.dma_semaphore, #tpu.memory_space<semaphore_mem>> -> memref<1x!tpu.dma_semaphore, #tpu.memory_space<semaphore_mem>>
    %5 = tpu.memref_squeeze %4 : memref<1x!tpu.dma_semaphore, #tpu.memory_space<semaphore_mem>> -> memref<!tpu.dma_semaphore, #tpu.memory_space<semaphore_mem>>
    tpu.wait_dma2 semaphore(%5 : memref<!tpu.dma_semaphore, #tpu.memory_space<semaphore_mem>>) src(%arg1 : memref<72x128xf32, #tpu.memory_space<any>>) dst(%arg4 : memref<72x128xf32, #tpu.memory_space<vmem>>)
    %c0 = arith.constant 0 : index
    %c0_1 = arith.constant 0 : index
    %6 = vector.load %arg0[%c0, %c0_1] : memref<4x16xf32, #tpu.memory_space<vmem>>, vector<4x16xf32>
    %c0_2 = arith.constant 0 : index
    %c0_3 = arith.constant 0 : index
    %7 = vector.load %arg4[%c0_2, %c0_3] : memref<72x128xf32, #tpu.memory_space<vmem>>, vector<16x16xf32>
    %c16 = arith.constant 16 : index
    %c0_4 = arith.constant 0 : index
    %8 = vector.load %arg4[%c16, %c0_4] : memref<72x128xf32, #tpu.memory_space<vmem>>, vector<1x16xf32>
    %cst = arith.constant dense<0.000000e+00> : vector<4x16xf32>
    %9 = tpu.matmul %6, %7, %cst {dimension_numbers = #tpu.dot_dimension_numbers<[1], [0], [0], [1], [0, 0, 1, 1], [], []>} : vector<4x16xf32>, vector<16x16xf32>, vector<4x16xf32> -> vector<4x16xf32>
    %10 = vector.broadcast %8 : vector<1x16xf32> to vector<4x16xf32>
    %11 = arith.addf %9, %10 : vector<4x16xf32>
    %12 = arith.negf %11 : vector<4x16xf32>
    %13 = math.exp %12 : vector<4x16xf32>
    %cst_5 = arith.constant 1.000000e+00 : f32
    %14 = vector.broadcast %cst_5 : f32 to vector<4x16xf32>
    %15 = arith.addf %14, %13 : vector<4x16xf32>
    %16 = arith.divf %14, %15 : vector<4x16xf32>
    %17 = arith.mulf %11, %16 : vector<4x16xf32>
    %c24 = arith.constant 24 : index
    %c0_6 = arith.constant 0 : index
    %18 = vector.load %arg4[%c24, %c0_6] : memref<72x128xf32, #tpu.memory_space<vmem>>, vector<16x8xf32>
    %c40 = arith.constant 40 : index
    %c0_7 = arith.constant 0 : index
    %19 = vector.load %arg4[%c40, %c0_7] : memref<72x128xf32, #tpu.memory_space<vmem>>, vector<1x8xf32>
    %cst_8 = arith.constant dense<0.000000e+00> : vector<4x8xf32>
    %20 = tpu.matmul %17, %18, %cst_8 {dimension_numbers = #tpu.dot_dimension_numbers<[1], [0], [0], [1], [0, 0, 1, 1], [], []>} : vector<4x16xf32>, vector<16x8xf32>, vector<4x8xf32> -> vector<4x8xf32>
    %21 = vector.broadcast %19 : vector<1x8xf32> to vector<4x8xf32>
    %22 = arith.addf %20, %21 : vector<4x8xf32>
    %23 = arith.negf %22 : vector<4x8xf32>
    %24 = math.exp %23 : vector<4x8xf32>
    %cst_9 = arith.constant 1.000000e+00 : f32
    %25 = vector.broadcast %cst_9 : f32 to vector<4x8xf32>
    %26 = arith.addf %25, %24 : vector<4x8xf32>
    %27 = arith.divf %25, %26 : vector<4x8xf32>
    %28 = arith.mulf %22, %27 : vector<4x8xf32>
    %c48 = arith.constant 48 : index
    %c0_10 = arith.constant 0 : index
    %29 = vector.load %arg4[%c48, %c0_10] : memref<72x128xf32, #tpu.memory_space<vmem>>, vector<8x8xf32>
    %c56 = arith.constant 56 : index
    %c0_11 = arith.constant 0 : index
    %30 = vector.load %arg4[%c56, %c0_11] : memref<72x128xf32, #tpu.memory_space<vmem>>, vector<1x8xf32>
    %cst_12 = arith.constant dense<0.000000e+00> : vector<4x8xf32>
    %31 = tpu.matmul %28, %29, %cst_12 {dimension_numbers = #tpu.dot_dimension_numbers<[1], [0], [0], [1], [0, 0, 1, 1], [], []>} : vector<4x8xf32>, vector<8x8xf32>, vector<4x8xf32> -> vector<4x8xf32>
    %32 = vector.broadcast %30 : vector<1x8xf32> to vector<4x8xf32>
    %33 = arith.addf %31, %32 : vector<4x8xf32>
    %c64 = arith.constant 64 : index
    %c0_13 = arith.constant 0 : index
    %34 = vector.load %arg4[%c64, %c0_13] : memref<72x128xf32, #tpu.memory_space<vmem>>, vector<8x64xf32>
    %cst_14 = arith.constant dense<0.000000e+00> : vector<4x64xf32>
    %35 = tpu.matmul %33, %34, %cst_14 {dimension_numbers = #tpu.dot_dimension_numbers<[1], [0], [0], [1], [0, 0, 1, 1], [], []>} : vector<4x8xf32>, vector<8x64xf32>, vector<4x64xf32> -> vector<4x64xf32>
    %c1_i32_15 = arith.constant 1 : i32
    %36 = tpu.memref_slice %arg6[%c1_i32_15] : memref<2x!tpu.dma_semaphore, #tpu.memory_space<semaphore_mem>> -> memref<1x!tpu.dma_semaphore, #tpu.memory_space<semaphore_mem>>
    %37 = tpu.memref_squeeze %36 : memref<1x!tpu.dma_semaphore, #tpu.memory_space<semaphore_mem>> -> memref<!tpu.dma_semaphore, #tpu.memory_space<semaphore_mem>>
    tpu.wait_dma2 semaphore(%37 : memref<!tpu.dma_semaphore, #tpu.memory_space<semaphore_mem>>) src(%arg2 : memref<312x128xf32, #tpu.memory_space<any>>) dst(%arg5 : memref<312x128xf32, #tpu.memory_space<vmem>>)
    %c0_16 = arith.constant 0 : index
    %c0_17 = arith.constant 0 : index
    %38 = vector.load %arg5[%c0_16, %c0_17] : memref<312x128xf32, #tpu.memory_space<vmem>>, vector<64x96xf32>
    %c64_18 = arith.constant 64 : index
    %c0_19 = arith.constant 0 : index
    %39 = vector.load %arg5[%c64_18, %c0_19] : memref<312x128xf32, #tpu.memory_space<vmem>>, vector<1x96xf32>
    %cst_20 = arith.constant dense<0.000000e+00> : vector<4x96xf32>
    %40 = tpu.matmul %35, %38, %cst_20 {dimension_numbers = #tpu.dot_dimension_numbers<[1], [0], [0], [1], [0, 0, 1, 1], [], []>} : vector<4x64xf32>, vector<64x96xf32>, vector<4x96xf32> -> vector<4x96xf32>
    %41 = vector.broadcast %39 : vector<1x96xf32> to vector<4x96xf32>
    %42 = arith.addf %40, %41 : vector<4x96xf32>
    %43 = arith.negf %42 : vector<4x96xf32>
    %44 = math.exp %43 : vector<4x96xf32>
    %cst_21 = arith.constant 1.000000e+00 : f32
    %45 = vector.broadcast %cst_21 : f32 to vector<4x96xf32>
    %46 = arith.addf %45, %44 : vector<4x96xf32>
    %47 = arith.divf %45, %46 : vector<4x96xf32>
    %48 = arith.mulf %42, %47 : vector<4x96xf32>
    %c72 = arith.constant 72 : index
    %c0_22 = arith.constant 0 : index
    %49 = vector.load %arg5[%c72, %c0_22] : memref<312x128xf32, #tpu.memory_space<vmem>>, vector<96x128xf32>
    %c168 = arith.constant 168 : index
    %c0_23 = arith.constant 0 : index
    %50 = vector.load %arg5[%c168, %c0_23] : memref<312x128xf32, #tpu.memory_space<vmem>>, vector<1x128xf32>
    %cst_24 = arith.constant dense<0.000000e+00> : vector<4x128xf32>
    %51 = tpu.matmul %48, %49, %cst_24 {dimension_numbers = #tpu.dot_dimension_numbers<[1], [0], [0], [1], [0, 0, 1, 1], [], []>} : vector<4x96xf32>, vector<96x128xf32>, vector<4x128xf32> -> vector<4x128xf32>
    %52 = vector.broadcast %50 : vector<1x128xf32> to vector<4x128xf32>
    %53 = arith.addf %51, %52 : vector<4x128xf32>
    %54 = arith.negf %53 : vector<4x128xf32>
    %55 = math.exp %54 : vector<4x128xf32>
    %cst_25 = arith.constant 1.000000e+00 : f32
    %56 = vector.broadcast %cst_25 : f32 to vector<4x128xf32>
    %57 = arith.addf %56, %55 : vector<4x128xf32>
    %58 = arith.divf %56, %57 : vector<4x128xf32>
    %59 = arith.mulf %53, %58 : vector<4x128xf32>
    %c176 = arith.constant 176 : index
    %c0_26 = arith.constant 0 : index
    %60 = vector.load %arg5[%c176, %c0_26] : memref<312x128xf32, #tpu.memory_space<vmem>>, vector<128x128xf32>
    %c304 = arith.constant 304 : index
    %c0_27 = arith.constant 0 : index
    %61 = vector.load %arg5[%c304, %c0_27] : memref<312x128xf32, #tpu.memory_space<vmem>>, vector<1x128xf32>
    %cst_28 = arith.constant dense<0.000000e+00> : vector<4x128xf32>
    %62 = tpu.matmul %59, %60, %cst_28 {dimension_numbers = #tpu.dot_dimension_numbers<[1], [0], [0], [1], [0, 0, 1, 1], [], []>} : vector<4x128xf32>, vector<128x128xf32>, vector<4x128xf32> -> vector<4x128xf32>
    %63 = vector.broadcast %61 : vector<1x128xf32> to vector<4x128xf32>
    %64 = arith.addf %62, %63 : vector<4x128xf32>
    %c0_29 = arith.constant 0 : index
    %c0_30 = arith.constant 0 : index
    %65 = vector.load %arg3[%c0_29, %c0_30] : memref<4x128xf32, #tpu.memory_space<vmem>>, vector<4x128xf32>
    tpu.vector_store %arg3[%c0_29, %c0_30], %64 {strides = array<i32>} : memref<4x128xf32, #tpu.memory_space<vmem>>, vector<4x128xf32>,
    return
  }
}

</mosaic_0001>

<bundles_post_ra>
// kernel: koopman_forward.1
= control target key start
LH: loop header
LB: loop body
LE: loop exit
PB: predicated region body
PF: predicated region fallthrough
CT: control target
= control target key end

     0   :  { %8 = vsyncpa [#allocation6], 0  ;;  %s942_s12 = smov [#allocation5]   ;;  %s1037_s0 = inlined_call_operand.hbm [shape: f32[4,16], index: 0, kind: input, shape index: {}]   ;;  %s1038_s1 = inlined_call_operand.hbm [shape: f32[72,128], index: 1, kind: input, shape index: {}]   ;;  %s1039_s2 = inlined_call_operand.hbm [shape: f32[312,128], index: 2, kind: input, shape index: {}]   ;;  %s1040_s3 = inlined_call_operand.vmem [shape: f32[4,128], index: 3, kind: output, shape index: {}]  }
   0x1   :  { %s15_s13 = sshll.u32 %s942_s12, 4  ;;  %s16_s13 = int_to_ptr.vmem [resolvable:$true] %s15_s13 }
   0x2   :  { %s884_s14 = scalar_lea.vmem %s16_s13, 64  ;;  %p889_p1 = scmp.lt.s32.totalorder %s16_s13, %s16_s13 }
   0x3   :  { %p885_p0 = scmp.ne.s32.totalorder %s16_s13, %s884_s14  ;;  %p890_p2 = scmp.lt.s32.totalorder %s884_s14, %s884_s14 }
   0x5   :  { %p891_p3 = por %p890_p2, %p889_p1 }
   0x7   :  { %p892_p4 = pnand %p891_p3, %p885_p0 }
   0x9   :  { %895 = shalt.err (!%p892_p4)
}
   0xa   :  { %18 = dma.hbm_to_vmem [thread:$0]  %s1037_s0, 64, %s16_s13, [#allocation6]  }
   0xb   :  { %936 = dma.done.wait [#allocation6], 64  }
   0xc   :  { %937 = vsyncadd [#allocation6], 4294967232  ;;  %s943_s17 = smov [#allocation2]   ;;  %s944_s19 = smov [#allocation3]  }
   0xd   :  { %s29_s18 = sshll.u32 %s943_s17, 4  ;;  %s41_s20 = sshll.u32 %s944_s19, 4  ;;  %s30_s18 = int_to_ptr.vmem [resolvable:$true] %s29_s18  ;;  %s42_s20 = int_to_ptr.vmem [resolvable:$true] %s41_s20 }
   0xe   :  { %s904_s21 = scalar_lea.vmem %s30_s18, 1152  ;;  %p909_p6 = scmp.lt.s32.totalorder %s30_s18, %s30_s18 }
   0xf   :  { %p905_p5 = scmp.ne.s32.totalorder %s30_s18, %s904_s21  ;;  %p910_p7 = scmp.lt.s32.totalorder %s904_s21, %s904_s21 }
  0x11   :  { %p911_p8 = por %p910_p7, %p909_p6 }
  0x13   :  { %p912_p9 = pnand %p911_p8, %p905_p5 }
  0x15   :  { %915 = shalt.err (!%p912_p9)  }
  0x16   :  { %32 = dma.hbm_to_vmem [thread:$0]  %s1038_s1, 1152, %s30_s18, [#allocation4] }
  0x17   :  { %s924_s0 = scalar_lea.vmem %s42_s20, 4992  ;;  %p929_p11 = scmp.lt.s32.totalorder %s42_s20, %s42_s20 }
  0x18   :  { %p925_p10 = scmp.ne.s32.totalorder %s42_s20, %s924_s0  ;;  %p930_p12 = scmp.lt.s32.totalorder %s924_s0, %s924_s0 }
  0x1a   :  { %p931_p13 = por %p930_p12, %p929_p11 }
  0x1c   :  { %p932_p0 = pnand %p931_p13, %p925_p10 }
  0x1e   :  { %935 = shalt.err (!%p932_p0)  }
  0x1f   :  { %44 = dma.hbm_to_vmem [thread:$0]  %s1039_s2, 4992, %s42_s20, [#allocation4 + $0x1] }
  0x20   :  { %938 = dma.done.wait [#allocation4], 1152 }
  0x21   :  { %939 = vsyncadd [#allocation4], 4294966144  ;;  %v945_v0 = vmov 0.0   ;;  %vm946_vm0 = vmmov 0   ;;  %v50_v1 = vld [vmem:[#allocation2 + $0x8] sm:$0xff]  ;;  %v49_v2 = vld [vmem:[#allocation2] sm:$0xff] }
  0x22   :  { %750 = vmatprep.subr.mxu0 %v945_v0  ;;  %754 = vmatprep.mubr.msk.f32.mxu0 %vm946_vm0, %v945_v0  ;;  %v48_v3 = vld [vmem:[#allocation5] sm:$0xf]  ;;  %vm56_vm1 = vcmask 130048   ;;  %v137_v5 = vld [vmem:[#allocation2 + $0x18] sm:$0xff]  ;;  %v683_v6 = vld [vmem:[#allocation2 + $0x10] ss:$0 sm:$0xff] }
  0x23   :  { %769 = vmatprep.subr.mxu1 %v945_v0  ;;  %771 = vmatprep.mubr.msk.f32.mxu1 %vm946_vm0, %v945_v0  ;;  %v138_v4 = vld [vmem:[#allocation2 + $0x20] sm:$0xff]  ;;  %v224_v15 = vld [vmem:[#allocation2 + $0x30] sm:$0xff]  ;;  %v686_v16 = vld [vmem:[#allocation2 + $0x28] ss:$0 sm:$0xff]  ;;  %vm230_vm2 = vcmask 64512  }
  0x24   :  { %751 = vmatpush3.msra.mxu0 %v50_v1  ;;  %v304_v25 = vld [vmem:[#allocation2 + $0x40] sm:$0xff]  ;;  %v689_v26 = vld [vmem:[#allocation2 + $0x38] ss:$0 sm:$0xff] }
  0x25   :  { %752 = vmatprep.subr.mxu0 %v945_v0  ;;  %770 = vmatpush3.msra.mxu1 %v304_v25 }
  0x26   :  { %753 = vmatpush3.msra.mxu0 %v49_v2 }
  0x27   :  { %755 = vmatmul.mubr.msk.f32.vlgmr.msra.gmra.mxu0 %vm56_vm1, %v48_v3  ;;  %757 = vmatprep.subr.mxu0 %v945_v0 }
  0x28   :  { %761 = vmatprep.mubr.msk.f32.mxu0 %vm946_vm0, %v945_v0  ;;  %758 = vmatpush3.msra.mxu0 %v138_v4 }
  0x29   :  { %759 = vmatprep.subr.mxu0 %v945_v0 }
  0x2a   :  { %760 = vmatpush3.msra.mxu0 %v137_v5 }
  0x2b   :  { %764 = vmatprep.subr.mxu0 %v945_v0 }
  0xe7   :  { %v126_v7 = vpop.f32.mrf.mxu0 }
  0xe8   :  { %v127_v8 = vadd.f32 %v683_v6, %v126_v7 }
  0xe9   :  { %v756_v9 = vpop.f32.mrf.mxu0 }
  0xea   :  { %v685_v10 = vmul.f32 -1.442695, %v127_v8 }
  0xec   :  { %860 = vpow2.f32 %v685_v10 }
  0xf9   :  { %v861_v11 = vpop.eup %860 }
  0xfa   :  { %v133_v12 = vadd.f32 1.0, %v861_v11 }
  0xfc   :  { %862 = vrcp.f32 %v133_v12 }
 0x109   :  { %v863_v13 = vpop.eup %862 }
 0x10a   :  { %v136_v14 = vmul.f32 %v863_v13, %v127_v8 }
 0x10c   :  { %762 = vmatmul.mubr.msk.f32.vlgmr.msra.gmra.mxu0 %vm56_vm1, %v136_v14 }
 0x10d   :  { %766 = vmatprep.mubr.msk.f32.mxu0 %vm946_vm0, %v945_v0  ;;  %765 = vmatpush3.msra.mxu0 %v224_v15 }
 0x1cc   :  { %v213_v17 = vpop.f32.mrf.mxu0 }
 0x1cd   :  { %v214_v18 = vadd.f32 %v686_v16, %v213_v17 }
 0x1ce   :  { %v763_v19 = vpop.f32.mrf.mxu0 }
 0x1cf   :  { %v688_v20 = vmul.f32 -1.442695, %v214_v18 }
 0x1d1   :  { %864 = vpow2.f32 %v688_v20 }
 0x1de   :  { %v865_v21 = vpop.eup %864 }
 0x1df   :  { %v220_v22 = vadd.f32 1.0, %v865_v21 }
 0x1e1   :  { %866 = vrcp.f32 %v220_v22 }
 0x1ee   :  { %v867_v23 = vpop.eup %866 }
 0x1ef   :  { %v223_v24 = vmul.f32 %v867_v23, %v214_v18 }
 0x1f1   :  { %767 = vmatmul.mubr.msk.f32.vlgmr.msra.gmra.mxu0 %vm230_vm2, %v223_v24 }
 0x2b1   :  { %v300_v27 = vpop.f32.mrf.mxu0 }
 0x2b2   :  { %v301_v28 = vadd.f32 %v689_v26, %v300_v27 }
 0x2b3   :  { %v768_v29 = vpop.f32.mrf.mxu0 }
 0x2b4   :  { %772 = vmatmul.mubr.msk.f32.vlgmr.msra.gmra.mxu1 %vm230_vm2, %v301_v28 }
 0x374   :  { %v374_v30 = vpop.f32.mrf.mxu1 }
 0x376   :  { %v773_v31 = vpop.f32.mrf.mxu1 }
 0x377   :  { %940 = dma.done.wait [#allocation4 + $0x1], 4992 }
 0x378   :  { %941 = vsyncadd [#allocation4 + $0x1], 4294962304  ;;  %774 = vmatprep.subr.mxu1 %v945_v0  ;;  %790 = vmatprep.mubr.msk.f32.mxu1 %vm946_vm0, %v945_v0  ;;  %v388_v32 = vld [vmem:[#allocation3 + $0x38] sm:$0xff]  ;;  %v387_v33 = vld [vmem:[#allocation3 + $0x30] sm:$0xff]  ;;  %vm394_vm3 = vcmask 523264   ;;  %vm492_vm4 = vcmask 785408  }
 0x379   :  { %820 = vmatprep.subr.mxu0 %v945_v0  ;;  %852 = vmatprep.mubr.msk.f32.mxu0 %vm946_vm0, %v945_v0  ;;  %v386_v34 = vld [vmem:[#allocation3 + $0x28] sm:$0xff]  ;;  %v385_v35 = vld [vmem:[#allocation3 + $0x20] sm:$0xff]  ;;  %v384_v36 = vld [vmem:[#allocation3 + $0x18] sm:$0xff] }
 0x37a   :  { %775 = vmatpush3.msra.mxu1 %v388_v32  ;;  %v383_v37 = vld [vmem:[#allocation3 + $0x10] sm:$0xff]  ;;  %v382_v38 = vld [vmem:[#allocation3 + $0x8] sm:$0xff]  ;;  %v381_v39 = vld [vmem:[#allocation3] sm:$0xff] }
 0x37b   :  { %776 = vmatprep.subr.mxu1 %v945_v0  ;;  %v486_v40 = vld [vmem:[#allocation3 + $0xa0] sm:$0xff]  ;;  %v485_v41 = vld [vmem:[#allocation3 + $0x98] sm:$0xff]  ;;  %v484_v42 = vld [vmem:[#allocation3 + $0x90] sm:$0xff] }
 0x37c   :  { %777 = vmatpush3.msra.mxu1 %v387_v33  ;;  %v483_v43 = vld [vmem:[#allocation3 + $0x88] sm:$0xff]  ;;  %v482_v44 = vld [vmem:[#allocation3 + $0x80] sm:$0xff]  ;;  %v481_v45 = vld [vmem:[#allocation3 + $0x78] sm:$0xff] }
 0x37d   :  { %778 = vmatprep.subr.mxu1 %v945_v0  ;;  %v480_v46 = vld [vmem:[#allocation3 + $0x70] sm:$0xff]  ;;  %v479_v47 = vld [vmem:[#allocation3 + $0x68] sm:$0xff]  ;;  %v478_v48 = vld [vmem:[#allocation3 + $0x60] sm:$0xff] }
 0x37e   :  { %779 = vmatpush3.msra.mxu1 %v386_v34  ;;  %v477_v49 = vld [vmem:[#allocation3 + $0x58] sm:$0xff]  ;;  %v476_v50 = vld [vmem:[#allocation3 + $0x50] sm:$0xff]  ;;  %v475_v51 = vld [vmem:[#allocation3 + $0x48] sm:$0xff] }
 0x37f   :  { %780 = vmatprep.subr.mxu1 %v945_v0  ;;  %v692_v52 = vld [vmem:[#allocation3 + $0x40] ss:$0 sm:$0xff]  ;;  %v588_v61 = vld [vmem:[#allocation3 + $0x128] sm:$0xff]  ;;  %v586_v63 = vld [vmem:[#allocation3 + $0x118] sm:$0xff] }
 0x380   :  { %781 = vmatpush3.msra.mxu1 %v385_v35  ;;  %821 = vmatpush3.msra.mxu0 %v588_v61  ;;  %v587_v62 = vld [vmem:[#allocation3 + $0x120] sm:$0xff]  ;;  %v585_v1 = vld [vmem:[#allocation3 + $0x110] sm:$0xff]  ;;  %v584_v2 = vld [vmem:[#allocation3 + $0x108] sm:$0xff] }
 0x381   :  { %782 = vmatprep.subr.mxu1 %v945_v0  ;;  %822 = vmatprep.subr.mxu0 %v945_v0  ;;  %v583_v3 = vld [vmem:[#allocation3 + $0x100] sm:$0xff]  ;;  %v582_v4 = vld [vmem:[#allocation3 + $0xf8] sm:$0xff]  ;;  %v581_v5 = vld [vmem:[#allocation3 + $0xf0] sm:$0xff] }
 0x382   :  { %783 = vmatpush3.msra.mxu1 %v384_v36  ;;  %823 = vmatpush3.msra.mxu0 %v587_v62  ;;  %v580_v6 = vld [vmem:[#allocation3 + $0xe8] sm:$0xff]  ;;  %v579_v7 = vld [vmem:[#allocation3 + $0xe0] sm:$0xff]  ;;  %v578_v8 = vld [vmem:[#allocation3 + $0xd8] sm:$0xff] }
 0x383   :  { %784 = vmatprep.subr.mxu1 %v945_v0  ;;  %824 = vmatprep.subr.mxu0 %v945_v0  ;;  %v577_v9 = vld [vmem:[#allocation3 + $0xd0] sm:$0xff]  ;;  %v576_v10 = vld [vmem:[#allocation3 + $0xc8] sm:$0xff]  ;;  %v575_v11 = vld [vmem:[#allocation3 + $0xc0] sm:$0xff] }
 0x384   :  { %785 = vmatpush3.msra.mxu1 %v383_v37  ;;  %825 = vmatpush3.msra.mxu0 %v586_v63  ;;  %v574_v12 = vld [vmem:[#allocation3 + $0xb8] sm:$0xff]  ;;  %v573_v13 = vld [vmem:[#allocation3 + $0xb0] sm:$0xff]  ;;  %v695_v14 = vld [vmem:[#allocation3 + $0xa8] ss:$0 sm:$0xff] }
 0x385   :  { %786 = vmatprep.subr.mxu1 %v945_v0  ;;  %826 = vmatprep.subr.mxu0 %v945_v0  ;;  %v698_v23 = vld [vmem:[#allocation3 + $0x130] ss:$0 sm:$0xff] }
 0x386   :  { %787 = vmatpush3.msra.mxu1 %v382_v38  ;;  %827 = vmatpush3.msra.mxu0 %v585_v1 }
 0x387   :  { %788 = vmatprep.subr.mxu1 %v945_v0  ;;  %828 = vmatprep.subr.mxu0 %v945_v0 }
 0x388   :  { %789 = vmatpush3.msra.mxu1 %v381_v39  ;;  %829 = vmatpush3.msra.mxu0 %v584_v2 }
 0x389   :  { %791 = vmatmul.mubr.msk.f32.vlgmr.msra.gmra.mxu1 %vm394_vm3, %v374_v30  ;;  %793 = vmatprep.subr.mxu1 %v945_v0 }
 0x38a   :  { %817 = vmatprep.mubr.msk.f32.mxu1 %vm946_vm0, %v945_v0  ;;  %794 = vmatpush3.msra.mxu1 %v486_v40 }
 0x38b   :  { %795 = vmatprep.subr.mxu1 %v945_v0  ;;  %830 = vmatprep.subr.mxu0 %v945_v0 }
 0x38c   :  { %796 = vmatpush3.msra.mxu1 %v485_v41  ;;  %831 = vmatpush3.msra.mxu0 %v583_v3 }
 0x38d   :  { %797 = vmatprep.subr.mxu1 %v945_v0  ;;  %832 = vmatprep.subr.mxu0 %v945_v0 }
 0x38e   :  { %798 = vmatpush3.msra.mxu1 %v484_v42  ;;  %833 = vmatpush3.msra.mxu0 %v582_v4 }
 0x38f   :  { %799 = vmatprep.subr.mxu1 %v945_v0  ;;  %834 = vmatprep.subr.mxu0 %v945_v0 }
 0x390   :  { %800 = vmatpush3.msra.mxu1 %v483_v43  ;;  %835 = vmatpush3.msra.mxu0 %v581_v5 }
 0x391   :  { %801 = vmatprep.subr.mxu1 %v945_v0  ;;  %836 = vmatprep.subr.mxu0 %v945_v0 }
 0x392   :  { %802 = vmatpush3.msra.mxu1 %v482_v44  ;;  %837 = vmatpush3.msra.mxu0 %v580_v6 }
 0x393   :  { %803 = vmatprep.subr.mxu1 %v945_v0  ;;  %838 = vmatprep.subr.mxu0 %v945_v0 }
 0x394   :  { %804 = vmatpush3.msra.mxu1 %v481_v45  ;;  %839 = vmatpush3.msra.mxu0 %v579_v7 }
 0x395   :  { %805 = vmatprep.subr.mxu1 %v945_v0  ;;  %840 = vmatprep.subr.mxu0 %v945_v0 }
 0x396   :  { %806 = vmatpush3.msra.mxu1 %v480_v46  ;;  %841 = vmatpush3.msra.mxu0 %v578_v8 }
 0x397   :  { %807 = vmatprep.subr.mxu1 %v945_v0  ;;  %842 = vmatprep.subr.mxu0 %v945_v0 }
 0x398   :  { %808 = vmatpush3.msra.mxu1 %v479_v47  ;;  %843 = vmatpush3.msra.mxu0 %v577_v9 }
 0x399   :  { %809 = vmatprep.subr.mxu1 %v945_v0  ;;  %844 = vmatprep.subr.mxu0 %v945_v0 }
 0x39a   :  { %810 = vmatpush3.msra.mxu1 %v478_v48  ;;  %845 = vmatpush3.msra.mxu0 %v576_v10 }
 0x39b   :  { %811 = vmatprep.subr.mxu1 %v945_v0  ;;  %846 = vmatprep.subr.mxu0 %v945_v0 }
 0x39c   :  { %812 = vmatpush3.msra.mxu1 %v477_v49  ;;  %847 = vmatpush3.msra.mxu0 %v575_v11 }
 0x39d   :  { %813 = vmatprep.subr.mxu1 %v945_v0  ;;  %848 = vmatprep.subr.mxu0 %v945_v0 }
 0x39e   :  { %814 = vmatpush3.msra.mxu1 %v476_v50  ;;  %849 = vmatpush3.msra.mxu0 %v574_v12 }
 0x39f   :  { %815 = vmatprep.subr.mxu1 %v945_v0  ;;  %850 = vmatprep.subr.mxu0 %v945_v0 }
 0x3a0   :  { %816 = vmatpush3.msra.mxu1 %v475_v51  ;;  %851 = vmatpush3.msra.mxu0 %v573_v13 }
 0x449   :  { %v464_v53 = vpop.f32.mrf.mxu1 }
 0x44a   :  { %v465_v54 = vadd.f32 %v692_v52, %v464_v53 }
 0x44b   :  { %v792_v55 = vpop.f32.mrf.mxu1 }
 0x44c   :  { %v694_v56 = vmul.f32 -1.442695, %v465_v54 }
 0x44e   :  { %868 = vpow2.f32 %v694_v56 }
 0x45b   :  { %v869_v57 = vpop.eup %868 }
 0x45c   :  { %v471_v58 = vadd.f32 1.0, %v869_v57 }
 0x45e   :  { %870 = vrcp.f32 %v471_v58 }
 0x46b   :  { %v871_v59 = vpop.eup %870 }
 0x46c   :  { %v474_v60 = vmul.f32 %v871_v59, %v465_v54 }
 0x46e   :  { %818 = vmatmul.mubr.msk.f32.vlgmr.msra.gmra.mxu1 %vm492_vm4, %v474_v60 }
 0x52e   :  { %v562_v15 = vpop.f32.mrf.mxu1 }
 0x52f   :  { %v563_v16 = vadd.f32 %v695_v14, %v562_v15 }
 0x530   :  { %v819_v17 = vpop.f32.mrf.mxu1 }
 0x531   :  { %v697_v18 = vmul.f32 -1.442695, %v563_v16 }
 0x533   :  { %872 = vpow2.f32 %v697_v18 }
 0x540   :  { %v873_v19 = vpop.eup %872 }
 0x541   :  { %v569_v20 = vadd.f32 1.0, %v873_v19 }
 0x543   :  { %874 = vrcp.f32 %v569_v20 }
 0x550   :  { %v875_v21 = vpop.eup %874 }
 0x551   :  { %v572_v22 = vmul.f32 %v875_v21, %v563_v16 }
 0x553   :  { %853 = vmatmul.mubr.f32.vlgmr.msra.gmra.mxu0 %v572_v22 }
 0x613   :  { %v660_v24 = vpop.f32.mrf.mxu0 }
 0x614   :  { %v661_v25 = vadd.f32 %v698_v23, %v660_v24 }
 0x615   :  { %v854_v26 = vpop.f32.mrf.mxu0 }
 0x616   :  { %664 = vst [vmem:[%s1040_s3] sm:$0xf] %v661_v25 }
 0x617   :  { %669 = vsyncpa [#allocation6], 1 }
 0x618   :  { %670 = vsyncmov [#allocation4] }
 0x61b   :  { %s671_s26 = vpop.sfrf %670 }
 0x61c   :  { %p699_p1 = scmp.ne.s32.totalorder %s671_s26, 0 }
 0x61e   :  { %675 = shalt.err (%p699_p1)  }
 0x61f   :  { %677 = vsyncmov [#allocation4 + $0x1] }
 0x622   :  { %s678_s27 = vpop.sfrf %677 }
 0x623   :  { %p700_p2 = scmp.ne.s32.totalorder %s678_s27, 0 }
 0x625   :  { %682 = shalt.err (%p700_p2)  }

</bundles_post_ra>
